<compile_context>
chip_gen: v7x
topology: tpu7x:2x2x1
jax: 0.10.0
libtpu: 0.0.40
codegen_flags: <defaults>
</compile_context>

<pallas_src>
import functools

import jax
import jax.numpy as jnp
from jax.experimental import pallas as pl
from jax.experimental.pallas import tpu as pltpu


def _mlp_kernel(x_ref, w1_ref, b1_ref, w2_ref, b2_ref, o_ref, *, matmul_dtype):
    # x_ref : (3, T)        pixels on the lane axis, T % 128 == 0
    # w1_ref: (hidden, 3)   b1_ref: (hidden, 1)
    # w2_ref: (3, hidden)   b2_ref: (3, 1)
    # o_ref : (3, T)
    x = x_ref[...].astype(matmul_dtype)
    w1 = w1_ref[...].astype(matmul_dtype)

    # Layer 1 on the MXU: (hidden,3) @ (3,T) -> (hidden,T), f32 accumulation.
    h = jnp.dot(w1, x, preferred_element_type=jnp.float32) + b1_ref[...]
    h = jnp.maximum(h, 0.0)                                    # ReLU

    # Layer 2 on the MXU: (3,hidden) @ (hidden,T) -> (3,T), f32 accumulation.
    w2 = w2_ref[...].astype(matmul_dtype)
    y = jnp.dot(w2, h.astype(matmul_dtype),
                preferred_element_type=jnp.float32) + b2_ref[...]
    o_ref[...] = jax.nn.sigmoid(y).astype(o_ref.dtype)         # Sigmoid


def _round_up(n, m):
    return ((n + m - 1) // m) * m


def _choose_tile_p(P, max_tile=2048, min_grid=4):
    """Pixels per grid step: multiple of 128, capped at max_tile, aiming for
    >= min_grid grid steps (>= 2 steps per TensorCore on v7x so per-core
    input/output DMA overlaps compute)."""
    tile = min(max_tile, _round_up(P, 128))
    while tile > 128 and pl.cdiv(P, tile) < min_grid:
        tile = max(128, _round_up(tile // 2, 128))
    return tile


def _run_mlp(x, w1, b1, w2, b2, *, tile_p, matmul_dtype):
    """x: (3, P) float32 -> (3, P) per-pixel MLP. P need NOT divide tile_p;
    the partial last block is masked by Pallas (no wrapper pad/slice)."""
    C, P = x.shape
    hidden = w1.shape[0]
    grid = (pl.cdiv(P, tile_p),)

    kernel = functools.partial(_mlp_kernel, matmul_dtype=matmul_dtype)
    return pl.pallas_call(
        kernel,
        out_shape=jax.ShapeDtypeStruct((C, P), x.dtype),
        grid_spec=pltpu.PrefetchScalarGridSpec(
            num_scalar_prefetch=0,
            grid=grid,
            in_specs=[
                pl.BlockSpec((C, tile_p), lambda i: (0, i)),      # pixels (lane-dense)
                pl.BlockSpec((hidden, 3), lambda i: (0, 0)),      # W1 (grid-invariant)
                pl.BlockSpec((hidden, 1), lambda i: (0, 0)),      # b1
                pl.BlockSpec((3, hidden), lambda i: (0, 0)),      # W2
                pl.BlockSpec((3, 1), lambda i: (0, 0)),           # b2
            ],
            out_specs=pl.BlockSpec((C, tile_p), lambda i: (0, i)),
        ),
        compiler_params=pltpu.CompilerParams(
            dimension_semantics=("parallel",),
        ),
    )(x, w1, b1, w2, b2)


class SimpleHdr2LdrConverterPallas:
    """Pallas-backed equivalent of the PyTorch SimpleHdr2LdrConverter."""

    def __init__(self, hidden_dim: int = 128, key=None, use_bf16_matmul: bool = True):
        if key is None:
            key = jax.random.PRNGKey(0)
        k1, k2, k3, k4 = jax.random.split(key, 4)
        # PyTorch-style uniform(-1/sqrt(fan_in), +1/sqrt(fan_in)); weights kept
        # in their native nn.Linear shapes: W1 (hidden, 3), W2 (3, hidden).
        bound1 = 1.0 / jnp.sqrt(3.0)
        bound2 = 1.0 / jnp.sqrt(float(hidden_dim))
        self.w1 = jax.random.uniform(k1, (hidden_dim, 3), jnp.float32, -bound1, bound1)
        self.b1 = jax.random.uniform(k2, (hidden_dim, 1), jnp.float32, -bound1, bound1)
        self.w2 = jax.random.uniform(k3, (3, hidden_dim), jnp.float32, -bound2, bound2)
        self.b2 = jax.random.uniform(k4, (3, 1), jnp.float32, -bound2, bound2)
        self.hidden_dim = hidden_dim
        # bf16 MXU operands (f32 accumulation) = single-pass matmuls; f32 path
        # kept for tight numeric validation.
        self.matmul_dtype = jnp.bfloat16 if use_bf16_matmul else jnp.float32

    # TODO(synk): torch.utils.checkpoint is a training-only remat; no-op in fwd.
    @functools.partial(jax.jit, static_argnums=0)
    def __call__(self, hdr):
        unsqueeze = False
        if hdr.ndim == 4:
            hdr = hdr[0]
            unsqueeze = True
        assert hdr.ndim == 3, f"hdr should be a 3-d tensor, but got {hdr.shape}"
        C, H, W = hdr.shape
        assert C == 3
        P = H * W

        # Native channel-major layout, pixels on the last (lane) axis — no transpose.
        x = hdr.reshape(C, P)

        tile_p = _choose_tile_p(P)
        y = _run_mlp(x, self.w1, self.b1, self.w2, self.b2,
                     tile_p=tile_p, matmul_dtype=self.matmul_dtype)

        ldr = y.reshape(C, H, W)
        if unsqueeze:
            ldr = ldr[None]
        return ldr


def _reference(hdr, w1, b1, w2, b2):
    """Pure-JAX reference of the PyTorch forward (HWC per-pixel MLP)."""
    squeeze = hdr.ndim == 4
    x = hdr[0] if squeeze else hdr
    x = jnp.transpose(x, (1, 2, 0))                                     # (H,W,3)
    hp = jax.lax.Precision.HIGHEST
    h = jnp.maximum(jnp.einsum("hwc,dc->hwd", x, w1, precision=hp) + b1[:, 0], 0.0)
    y = jax.nn.sigmoid(jnp.einsum("hwd,cd->hwc", h, w2, precision=hp) + b2[:, 0])
    y = jnp.transpose(y, (2, 0, 1))                                     # (3,H,W)
    return y[None] if squeeze else y


if __name__ == "__main__":
    key = jax.random.PRNGKey(0)
    k_in, k_in2, k_param = jax.random.split(key, 3)

    # --- f32 matmul path: tight validation against the reference. ---
    model_f32 = SimpleHdr2LdrConverterPallas(hidden_dim=128, key=k_param,
                                             use_bf16_matmul=False)

    # 4-D NCHW input with C=3 (module slices batch [0]).
    hdr = jax.random.uniform(k_in, (1, 3, 16, 16), jnp.float32) * 4.0
    ldr = jax.block_until_ready(model_f32(hdr))
    ref = _reference(hdr, model_f32.w1, model_f32.b1, model_f32.w2, model_f32.b2)
    assert ldr.shape == hdr.shape, (ldr.shape, hdr.shape)
    assert jnp.allclose(ldr, ref, atol=5e-4, rtol=5e-4), \
        float(jnp.max(jnp.abs(ldr - ref)))

    # 3-D CHW input whose pixel count is NOT a multiple of 128
    # (exercises the masked partial last block — no wrapper pad/slice).
    hdr3 = jax.random.uniform(k_in2, (3, 24, 20), jnp.float32) * 4.0
    ldr3 = jax.block_until_ready(model_f32(hdr3))
    ref3 = _reference(hdr3, model_f32.w1, model_f32.b1, model_f32.w2, model_f32.b2)
    assert ldr3.shape == hdr3.shape, (ldr3.shape, hdr3.shape)
    assert jnp.allclose(ldr3, ref3, atol=5e-4, rtol=5e-4), \
        float(jnp.max(jnp.abs(ldr3 - ref3)))

    # --- bf16 matmul path (default / fast): relaxed tolerance. ---
    model_bf16 = SimpleHdr2LdrConverterPallas(hidden_dim=128, key=k_param,
                                              use_bf16_matmul=True)
    ldr_b = jax.block_until_ready(model_bf16(hdr))
    assert ldr_b.shape == hdr.shape, (ldr_b.shape, hdr.shape)
    assert jnp.allclose(ldr_b, ref, atol=3e-2, rtol=3e-2), \
        float(jnp.max(jnp.abs(ldr_b - ref)))
    ldr3_b = jax.block_until_ready(model_bf16(hdr3))
    assert ldr3_b.shape == hdr3.shape, (ldr3_b.shape, hdr3.shape)
    assert jnp.allclose(ldr3_b, ref3, atol=3e-2, rtol=3e-2), \
        float(jnp.max(jnp.abs(ldr3_b - ref3)))

    print("KERNEL_OK")
</pallas_src>

<mosaic_0001>
module attributes {stable_mosaic.version = 11 : i64} {
  func.func @_mlp_kernel(%arg0: i32, %arg1: memref<3x128xf32, #tpu.memory_space<vmem>>, %arg2: memref<128x3xf32, #tpu.memory_space<vmem>>, %arg3: memref<128x1xf32, #tpu.memory_space<vmem>>, %arg4: memref<3x128xf32, #tpu.memory_space<vmem>>, %arg5: memref<3x1xf32, #tpu.memory_space<vmem>>, %arg6: memref<3x128xf32, #tpu.memory_space<vmem>>) attributes {dimension_semantics = [#tpu.dimension_semantics<parallel>], iteration_bounds = array<i64: 2>, scalar_prefetch = 0 : i64, scratch_operands = 0 : i64, tpu.core_type = #tpu.core_type<tc>, window_params = [{transform_indices = @transform_0, window_bounds = array<i64: 3, 128>}, {pipeline_mode = #tpu.pipeline_mode<synchronous>, transform_indices = @transform_1, window_bounds = array<i64: 128, 3>}, {pipeline_mode = #tpu.pipeline_mode<synchronous>, transform_indices = @transform_2, window_bounds = array<i64: 128, 1>}, {pipeline_mode = #tpu.pipeline_mode<synchronous>, transform_indices = @transform_3, window_bounds = array<i64: 3, 128>}, {pipeline_mode = #tpu.pipeline_mode<synchronous>, transform_indices = @transform_4, window_bounds = array<i64: 3, 1>}, {transform_indices = @transform_5, window_bounds = array<i64: 3, 128>}]} {
    %c0 = arith.constant 0 : index
    %c0_0 = arith.constant 0 : index
    %0 = vector.load %arg1[%c0, %c0_0] : memref<3x128xf32, #tpu.memory_space<vmem>>, vector<3x128xf32>
    %c0_1 = arith.constant 0 : index
    %c0_2 = arith.constant 0 : index
    %1 = vector.load %arg2[%c0_1, %c0_2] : memref<128x3xf32, #tpu.memory_space<vmem>>, vector<128x3xf32>
    %cst = arith.constant dense<0.000000e+00> : vector<128x128xf32>
    %2 = tpu.matmul %1, %0, %cst {dimension_numbers = #tpu.dot_dimension_numbers<[1], [0], [0], [1], [0, 0, 1, 1], [], []>} : vector<128x3xf32>, vector<3x128xf32>, vector<128x128xf32> -> vector<128x128xf32>
    %c0_3 = arith.constant 0 : index
    %c0_4 = arith.constant 0 : index
    %3 = vector.load %arg3[%c0_3, %c0_4] : memref<128x1xf32, #tpu.memory_space<vmem>>, vector<128x1xf32>
    %4 = vector.broadcast %3 : vector<128x1xf32> to vector<128x128xf32>
    %5 = arith.addf %2, %4 : vector<128x128xf32>
    %cst_5 = arith.constant 0.000000e+00 : f32
    %6 = vector.broadcast %cst_5 : f32 to vector<128x128xf32>
    %7 = arith.maximumf %5, %6 : vector<128x128xf32>
    %c0_6 = arith.constant 0 : index
    %c0_7 = arith.constant 0 : index
    %8 = vector.load %arg4[%c0_6, %c0_7] : memref<3x128xf32, #tpu.memory_space<vmem>>, vector<3x128xf32>
    %cst_8 = arith.constant dense<0.000000e+00> : vector<3x128xf32>
    %9 = tpu.matmul %8, %7, %cst_8 {dimension_numbers = #tpu.dot_dimension_numbers<[1], [0], [0], [1], [0, 0, 1, 1], [], []>} : vector<3x128xf32>, vector<128x128xf32>, vector<3x128xf32> -> vector<3x128xf32>
    %c0_9 = arith.constant 0 : index
    %c0_10 = arith.constant 0 : index
    %10 = vector.load %arg5[%c0_9, %c0_10] : memref<3x1xf32, #tpu.memory_space<vmem>>, vector<3x1xf32>
    %11 = vector.broadcast %10 : vector<3x1xf32> to vector<3x128xf32>
    %12 = arith.addf %9, %11 : vector<3x128xf32>
    %13 = arith.negf %12 : vector<3x128xf32>
    %14 = math.exp %13 : vector<3x128xf32>
    %cst_11 = arith.constant 1.000000e+00 : f32
    %15 = vector.broadcast %cst_11 : f32 to vector<3x128xf32>
    %16 = arith.addf %15, %14 : vector<3x128xf32>
    %17 = arith.divf %15, %16 : vector<3x128xf32>
    %c0_12 = arith.constant 0 : index
    %c0_13 = arith.constant 0 : index
    %18 = vector.load %arg6[%c0_12, %c0_13] : memref<3x128xf32, #tpu.memory_space<vmem>>, vector<3x128xf32>
    tpu.vector_store %arg6[%c0_12, %c0_13], %17 {strides = array<i32>} : memref<3x128xf32, #tpu.memory_space<vmem>>, vector<3x128xf32>,
    return
  }
  func.func @transform_0(%arg0: i32) -> (i32, i32) {
    %c0_i32 = arith.constant 0 : i32
    %c0_i32_0 = arith.constant 0 : i32
    return %c0_i32, %arg0 : i32, i32
  }
  func.func @transform_1(%arg0: i32) -> (i32, i32) {
    %c0_i32 = arith.constant 0 : i32
    %c0_i32_0 = arith.constant 0 : i32
    %c0_i32_1 = arith.constant 0 : i32
    return %c0_i32, %c0_i32_0 : i32, i32
  }
  func.func @transform_2(%arg0: i32) -> (i32, i32) {
    %c0_i32 = arith.constant 0 : i32
    %c0_i32_0 = arith.constant 0 : i32
    %c0_i32_1 = arith.constant 0 : i32
    return %c0_i32, %c0_i32_0 : i32, i32
  }
  func.func @transform_3(%arg0: i32) -> (i32, i32) {
    %c0_i32 = arith.constant 0 : i32
    %c0_i32_0 = arith.constant 0 : i32
    %c0_i32_1 = arith.constant 0 : i32
    return %c0_i32, %c0_i32_0 : i32, i32
  }
  func.func @transform_4(%arg0: i32) -> (i32, i32) {
    %c0_i32 = arith.constant 0 : i32
    %c0_i32_0 = arith.constant 0 : i32
    %c0_i32_1 = arith.constant 0 : i32
    return %c0_i32, %c0_i32_0 : i32, i32
  }
  func.func @transform_5(%arg0: i32) -> (i32, i32) {
    %c0_i32 = arith.constant 0 : i32
    %c0_i32_0 = arith.constant 0 : i32
    return %c0_i32, %arg0 : i32, i32
  }
}

</mosaic_0001>

<bundles_post_ra>
// kernel: squeeze.1
= control target key start
LH: loop header
LB: loop body
LE: loop exit
PB: predicated region body
PF: predicated region fallthrough
CT: control target
= control target key end

     0   :  { %2 = vsyncpa [#allocation1], 0  ;;  %s201_s6 = smov [#allocation0]   ;;  %s255_s0 = inlined_call_operand.hbm [shape: f32[1,3,16,16], index: 0, kind: input, shape index: {}]   ;;  %s256_s1 = inlined_call_operand.vmem [shape: f32[3,256], index: 1, kind: output, shape index: {}]  }
   0x1   :  { %s7_s7 = sshll.u32 %s201_s6, 4  ;;  %s177_s10 = scalar_lea.hbm %s255_s0, 768  ;;  %s8_s7 = int_to_ptr.vmem [resolvable:$true] %s7_s7 }
   0x2   :  { %p178_p0 = scmp.ne.s32.totalorder %s255_s0, %s177_s10  ;;  %p181_p1 = scmp.lt.u32.totalorder %s177_s10, %s255_s0 }
   0x4   :  { %p183_p2 = pnand %p181_p1, %p178_p0 }
   0x6   :  { %186 = shalt.err (!%p183_p2)
}
   0x7   :  { %s187_s15 = scalar_lea.vmem %s8_s7, 768  ;;  %p192_p4 = scmp.lt.s32.totalorder %s8_s7, %s8_s7 }
   0x8   :  { %p188_p3 = scmp.ne.s32.totalorder %s8_s7, %s187_s15  ;;  %p193_p5 = scmp.lt.s32.totalorder %s187_s15, %s187_s15 }
   0xa   :  { %p194_p6 = por %p193_p5, %p192_p4 }
   0xc   :  { %p195_p7 = pnand %p194_p6, %p188_p3 }
   0xe   :  { %198 = shalt.err (!%p195_p7)
}
   0xf   :  { %10 = dma.hbm_to_vmem [thread:$0]  %s255_s0, 768, %s8_s7, [#allocation1]  }
  0x10   :  { %199 = dma.done.wait [#allocation1], 768  }
  0x11   :  { %200 = vsyncadd [#allocation1], 4294966528  ;;  %s24_s0 = smov 3  ;;  %s27_s18 = smov 12  ;;  %vm29_vm0 = vcmask 1043458   ;;  %vm15_vm1 = vcmask 1045508  }
  0x12   :  { %s32_s19 = smov 48  ;;  %s62_s20 = smov 3  ;;  %v25_v0 = vld [vmem:[#allocation0 + $0x7] ss:$16 sm:%s24_s0]   ;;  %vm17_vm2 = vcmask 130048   ;;  %vm38_vm3 = vcmask 1048448  }
  0x13   :  { %s65_s21 = smov 12  ;;  %s70_s22 = smov 48  ;;  %v28_v1 = vld [vmem:[#allocation0 + $0x57] ss:$-24 sm:%s27_s18]   ;;  %v63_v4 = vld [vmem:[#allocation0 + $0x5] ss:$16 sm:%s62_s20]  }
  0x14   :  { %s43_s23 = smov 3  ;;  %s46_s24 = smov 12  ;;  %v33_v2 = vld [vmem:[#allocation0 - $0x21] ss:$16 sm:%s32_s19]   ;;  %v30_v3 = vsel %vm29_vm0, %v28_v1, %v25_v0  ;;  %v66_v5 = vld [vmem:[#allocation0 + $0x55] ss:$-24 sm:%s65_s21]  }
  0x15   :  { %s51_s25 = smov 48  ;;  %s81_s26 = smov 3  ;;  %v71_v6 = vld [vmem:[#allocation0 - $0x23] ss:$16 sm:%s70_s22]   ;;  %v35_v7 = vsel %vm15_vm1, %v33_v2, %v30_v3  ;;  %v68_v8 = vsel %vm29_vm0, %v66_v5, %v63_v4  ;;  %v44_v9 = vld [vmem:[#allocation0 + $0x6] ss:$16 sm:%s43_s23]  }
  0x16   :  { %s84_s27 = smov 12  ;;  %v47_v10 = vld [vmem:[#allocation0 + $0x56] ss:$-24 sm:%s46_s24]   ;;  %s202_s28 = smov 112   ;;  %v73_v12 = vsel %vm15_vm1, %v71_v6, %v68_v8  ;;  %v82_v14 = vld [vmem:[#allocation0 + $0x4] ss:$16 sm:%s81_s26]  }
  0x17   :  { %v52_v11 = vld [vmem:[#allocation0 - $0x22] ss:$16 sm:%s51_s25]   ;;  %36 = vrot.lane.b32.xlu0 %v35_v7, %s202_s28  ;;  %v49_v13 = vsel %vm29_vm0, %v47_v10, %v44_v9  ;;  %v85_v15 = vld [vmem:[#allocation0 + $0x54] ss:$-24 sm:%s84_s27]   ;;  %s89_s29 = smov 48  ;;  %s203_s30 = smov 80  }
  0x18   :  { %74 = vrot.lane.b32.xlu1 %v73_v12, %s203_s30  ;;  %v54_v16 = vsel %vm15_vm1, %v52_v11, %v49_v13  ;;  %v87_v17 = vsel %vm29_vm0, %v85_v15, %v82_v14  ;;  %v90_v18 = vld [vmem:[#allocation0 - $0x24] ss:$16 sm:%s89_s29]   ;;  %s100_s2 = smov 3  ;;  %s103_s3 = smov 12  ;;  %vm57_vm4 = vcmask 917248   ;;  %vm76_vm5 = vcmask 786048  }
  0x19   :  { %v92_v19 = vsel %vm15_vm1, %v90_v18, %v87_v17  ;;  %v101_v20 = vld [vmem:[#allocation0 + $0x3] ss:$16 sm:%s100_s2]   ;;  %s108_s4 = smov 48  ;;  %s119_s5 = smov 3  ;;  %vm95_vm6 = vcmask 654848   ;;  %vm114_vm7 = vcmask 523648  }
  0x1a   :  { %v104_v21 = vld [vmem:[#allocation0 + $0x53] ss:$-24 sm:%s103_s3]   ;;  %s122_s6 = smov 12  ;;  %s204_s7 = smov 96   ;;  %v120_v24 = vld [vmem:[#allocation0 + $0x2] ss:$16 sm:%s119_s5]  }
  0x1b   :  { %v106_v22 = vsel %vm29_vm0, %v104_v21, %v101_v20  ;;  %v109_v23 = vld [vmem:[#allocation0 - $0x25] ss:$16 sm:%s108_s4]   ;;  %55 = vrot.lane.b32.xlu0 %v54_v16, %s204_s7  ;;  %v123_v25 = vld [vmem:[#allocation0 + $0x52] ss:$-24 sm:%s122_s6]   ;;  %s127_s8 = smov 48  ;;  %s205_s9 = smov 64  }
  0x1c   :  { %93 = vrot.lane.b32.xlu1 %v92_v19, %s205_s9  ;;  %v111_v26 = vsel %vm15_vm1, %v109_v23, %v106_v22  ;;  %v125_v27 = vsel %vm29_vm0, %v123_v25, %v120_v24  ;;  %v128_v28 = vld [vmem:[#allocation0 - $0x26] ss:$16 sm:%s127_s8]   ;;  %s138_s10 = smov 3  ;;  %s141_s11 = smov 12  ;;  %vm133_vm8 = vcmask 392448   ;;  %vm152_vm9 = vcmask 261248  }
  0x1d   :  { %v130_v29 = vsel %vm15_vm1, %v128_v28, %v125_v27  ;;  %v139_v30 = vld [vmem:[#allocation0 + $0x1] ss:$16 sm:%s138_s10]   ;;  %s146_s12 = smov 48  ;;  %s13_s13 = smov 48 }
  0x1e   :  { %v142_v31 = vld [vmem:[#allocation0 + $0x51] ss:$-24 sm:%s141_s11]   ;;  %v12_v34 = vld [vmem:[#allocation0] ss:$8 sm:$0xf]   ;;  %s206_s14 = smov 48  }
  0x1f   :  { %v144_v32 = vsel %vm29_vm0, %v142_v31, %v139_v30  ;;  %v147_v33 = vld [vmem:[#allocation0 - $0x27] ss:$16 sm:%s146_s12]   ;;  %112 = vrot.lane.b32.xlu0 %v111_v26, %s206_s14  ;;  %v14_v35 = vld [vmem:[#allocation0] ss:$8 sm:%s13_s13]   ;;  %s207_s15 = smov 32   ;;  %s208_s16 = smov 16  }
  0x20   :  { %131 = vrot.lane.b32.xlu1 %v130_v29, %s207_s15  ;;  %v149_v36 = vsel %vm15_vm1, %v147_v33, %v144_v32  ;;  %v16_v37 = vsel %vm15_vm1, %v14_v35, %v12_v34 }
  0x21   :  { %18 = vst.msk [vmem:[#allocation2] ss:$8 sm:$0x3] %vm17_vm2, %v16_v37   ;;  %20 = vst.msk [vmem:[#allocation2 - $0xf] ss:$8 sm:$0xc] %vm17_vm2, %v16_v37  }
  0x22   :  { %22 = vst.msk [vmem:[#allocation2 - $0x1e] ss:$8 sm:$0x30] %vm17_vm2, %v16_v37  }
  0x23   :  { %150 = vrot.lane.b32.xlu0 %v149_v36, %s208_s16 }
  0x89   :  { %v37_v38 = vpop.permute.xlu0 %36  }
  0x8a   :  { %v75_v39 = vpop.permute.xlu1 %74   ;;  %39 = vst.msk [vmem:[#allocation2] sm:$0x7] %vm38_vm3, %v37_v38   ;;  %41 = vst.msk [vmem:[#allocation2 + $0x5] sm:$0x38] %vm38_vm3, %v37_v38  }
  0x8d   :  { %v56_v40 = vpop.permute.xlu0 %55  }
  0x8e   :  { %58 = vst.msk [vmem:[#allocation2] sm:$0x7] %vm57_vm4, %v56_v40   ;;  %60 = vst.msk [vmem:[#allocation2 + $0x5] sm:$0x38] %vm57_vm4, %v56_v40   ;;  %v94_v41 = vpop.permute.xlu1 %93  }
  0x8f   :  { %77 = vst.msk [vmem:[#allocation2] sm:$0x7] %vm76_vm5, %v75_v39   ;;  %79 = vst.msk [vmem:[#allocation2 + $0x5] sm:$0x38] %vm76_vm5, %v75_v39  }
  0x90   :  { %96 = vst.msk [vmem:[#allocation2] sm:$0x7] %vm95_vm6, %v94_v41   ;;  %98 = vst.msk [vmem:[#allocation2 + $0x5] sm:$0x38] %vm95_vm6, %v94_v41  }
  0x91   :  { %v113_v42 = vpop.permute.xlu0 %112  }
  0x92   :  { %115 = vst.msk [vmem:[#allocation2] sm:$0x7] %vm114_vm7, %v113_v42   ;;  %117 = vst.msk [vmem:[#allocation2 + $0x5] sm:$0x38] %vm114_vm7, %v113_v42   ;;  %v132_v43 = vpop.permute.xlu1 %131  }
  0x93   :  { %134 = vst.msk [vmem:[#allocation2] sm:$0x7] %vm133_vm8, %v132_v43   ;;  %136 = vst.msk [vmem:[#allocation2 + $0x5] sm:$0x38] %vm133_vm8, %v132_v43  }
  0x95   :  { %v151_v44 = vpop.permute.xlu0 %150  }
  0x96   :  { %153 = vst.msk [vmem:[#allocation2] sm:$0x7] %vm152_vm9, %v151_v44   ;;  %155 = vst.msk [vmem:[#allocation2 + $0x5] sm:$0x38] %vm152_vm9, %v151_v44  }
  0x9d   :  { %v159_v45 = vld [vmem:[#allocation2] sm:$0xf]  ;;  %v163_v46 = vld [vmem:[#allocation2 + $0x8] sm:$0xf] }
  0x9e   :  { %161 = vst [vmem:[%s256_s1] sm:$0xf] %v159_v45  ;;  %168 = vst [vmem:[%s256_s1 + $0x4] sm:$0xf] %v163_v46 }
  0x9f   :  { %167 = vsyncpa [#allocation1], 1 }

// kernel: a_call__.1
= control target key start
LH: loop header
LB: loop body
LE: loop exit
PB: predicated region body
PF: predicated region fallthrough
CT: control target
= control target key end

     0   :  { %10 = vsyncpa [#allocation3], 0  ;;  %s1167_s0 = inlined_call_operand.vmem [shape: f32[3,256], index: 0, kind: input, shape index: {}]   ;;  %s1168_s1 = inlined_call_operand.hbm [shape: f32[128,3], index: 1, kind: input, shape index: {}]   ;;  %s1169_s2 = inlined_call_operand.hbm [shape: f32[128,1], index: 2, kind: input, shape index: {}]   ;;  %s1170_s3 = inlined_call_operand.vmem [shape: f32[3,128], index: 3, kind: input, shape index: {}]   ;;  %s1171_s4 = inlined_call_operand.vmem [shape: f32[3,1], index: 4, kind: input, shape index: {}]   ;;  %s1172_s5 = inlined_call_operand.vmem [shape: f32[3,256], index: 5, kind: output, shape index: {}]  }
   0x1   :  { %11 = vsyncpa [#allocation5], 0  ;;  %s1037_s18 = smov 0  }
   0x2 LB: > { %s1043_s19 = sadd.s32 4294967295, %s997_s18   ;;  %p738_p0 = scmp.ge.s32.totalorder %s997_s18, 1  ;;  %s997_s18 = sphi %s1037_s18, %s17_s18  }
   0x3   : > { %p158_p1 = scmp.lt.s32.totalorder %s997_s18, 3  ;;  %s999_s20 = smov [#allocation2]  }
   0x4   : > { %s170_s21 = sshll.u32 %s999_s20, 4  ;;  %p1173_p3 = scmp.eq.s32.totalorder %s1043_s19, 0  ;;  %s171_s21 = int_to_ptr.vmem [resolvable:$true] %s170_s21 }
   0x5   : > { %p1047_p2 = pnand %p738_p0, %p158_p1  ;;  %s1000_s23 = smov [#allocation4]  }
   0x6   : > { %s183_s24 = sshll.u32 %s1000_s23, 4  ;;  %s927_s28 = scalar_lea.hbm %s1168_s1, 2048  ;;  %s1060_s24 = int_to_ptr.vmem [resolvable:$true] %s183_s24 }
   0x7   : > { %s1175_s22 = scalar_select %p1047_p2, 1, 0 }
   0x8   : > { %p894_p4 = pneg %p1047_p2  ;;  %p928_p6 = scmp.ne.s32.totalorder %s1168_s1, %s927_s28 }
   0x9   : > { %p934_p10 = scmp.lt.u32.totalorder %s927_s28, %s1168_s1 }
   0xa   : > { %p1056_p5 = pnand %p1173_p3, %p894_p4 }
   0xc   : > { %p929_p7 = pneg %p1056_p5 }
   0xe   : > { %p930_p8 = pnand %p929_p7, %p928_p6 }
  0x10   : > { %p931_p9 = pneg %p930_p8 }
  0x12   : > { %p936_p11 = pnand %p934_p10, %p931_p9 }
  0x14   : > { %939 = shalt.err (!%p936_p11)
}
  0x15   : > { %s940_s8 = scalar_lea.vmem %s171_s21, 2048  ;;  %p948_p1 = scmp.lt.s32.totalorder %s171_s21, %s171_s21 }
  0x16   : > { %p941_p12 = scmp.ne.s32.totalorder %s171_s21, %s940_s8  ;;  %p949_p4 = scmp.lt.s32.totalorder %s940_s8, %s940_s8 }
  0x18   : > { %p943_p13 = pnand %p941_p12, %p929_p7  ;;  %p950_p3 = por %p949_p4, %p948_p1 }
  0x1a   : > { %p944_p0 = pneg %p943_p13 }
  0x1c   : > { %p951_p2 = pnand %p950_p3, %p944_p0 }
  0x1e   : > { %954 = shalt.err (!%p951_p2)
}
  0x1f   : > { %s1001_s9 = smov 128   ;;  %s1002_s10 = smov 8  }
  0x20   : > { %897 = dma.hbm_to_vmem [thread:$0]  (!%p1056_p5), %s1168_s1, 2048, %s171_s21, [#allocation3], %s1001_s9, %s1001_s9, %s1002_s10  }
  0x21   : > { %s955_s15 = scalar_lea.hbm %s1169_s2, 2048 }
  0x22   : > { %p956_p6 = scmp.ne.s32.totalorder %s1169_s2, %s955_s15  ;;  %p962_p8 = scmp.lt.u32.totalorder %s955_s15, %s1169_s2 }
  0x24   : > { %p958_p2 = pnand %p956_p6, %p929_p7 }
  0x26   : > { %p959_p3 = pneg %p958_p2 }
  0x28   : > { %p964_p9 = pnand %p962_p8, %p959_p3 }
  0x2a   : > { %967 = shalt.err (!%p964_p9)
}
  0x2b   : > { %s968_s21 = scalar_lea.vmem %s1060_s24, 2048  ;;  %p976_p13 = scmp.lt.s32.totalorder %s1060_s24, %s1060_s24 }
  0x2c   : > { %p969_p10 = scmp.ne.s32.totalorder %s1060_s24, %s968_s21  ;;  %p977_p0 = scmp.lt.s32.totalorder %s968_s21, %s968_s21 }
  0x2e   : > { %p971_p11 = pnand %p969_p10, %p929_p7  ;;  %p978_p1 = por %p977_p0, %p976_p13 }
  0x30   : > { %p972_p12 = pneg %p971_p11 }
  0x32   : > { %p979_p4 = pnand %p978_p1, %p972_p12 }
  0x34   : > { %982 = shalt.err (!%p979_p4)
}
  0x35   : > { %900 = dma.hbm_to_vmem [thread:$0]  (!%p1056_p5), %s1169_s2, 2048, %s1060_s24, [#allocation5], %s1001_s9, %s1001_s9, %s1002_s10  }
  0x36   : > { %p1177_p6 = scmp.ne.s32.totalorder %s1175_s22, 0 }
  0x37   : > { %p1178_p2 = scmp.eq.s32.totalorder (!%p1177_p6), %s1043_s19, 0 }
  0x38   : > { %212 = sbr.rel (%p1177_p6) target bundleno = 566 (0x236), region = 40 }
  0x3f   : > { %988 = dma.done.wait (%p1178_p2), [#allocation3], 2048   ;;  %p1179_p7 = pmov %p1178_p2 }
  0x40   : > { %p1180_p3 = pmov %p1178_p2 }
  0x41   : > { %990 = vsyncadd (%p1179_p7), [#allocation3], 4294965248 }
  0x42   : > { %992 = dma.done.wait (%p1180_p3), [#allocation5], 2048   ;;  %p1181_p8 = pmov %p1178_p2 }
  0x43   : > { %p242_p9 = scmp.lt.s32.totalorder %s1043_s19, 1  ;;  %v1003_v0 = vmov 0   ;;  %vm412_vm0 = vcmask 1042432   ;;  %vm363_vm1 = vcmask 23552   ;;  %v251_v2 = vld [vmem:[#allocation2] sm:$0xff]  ;;  %v252_v3 = vld [vmem:[#allocation2 + $0x8] sm:$0xff] }
  0x44   : > { %994 = vsyncadd (%p1181_p8), [#allocation5], 4294965248  ;;  %921 = vset.pattern.permute.xlu0 %v1003_v0  ;;  %922 = vset.pattern.permute.xlu1 %v1003_v0  ;;  %v253_v4 = vld [vmem:[#allocation2 + $0x10] sm:$0xff]  ;;  %v254_v5 = vld [vmem:[#allocation2 + $0x18] sm:$0xff]  ;;  %v1004_v35 = vmov 0.0|0.0   ;;  %vm1005_vm2 = vmmov 0  }
  0x45   : > { %s1183_s19 = smov (!%p242_p9, %s1043_s19), 1  ;;  %803 = vmatprep.mubr.msk.f32.mxu0 %vm363_vm1, %v251_v2  ;;  %v255_v6 = vld [vmem:[#allocation2 + $0x20] sm:$0xff]  ;;  %v269_v8 = vld [vmem:[#allocation4 + $0x10] sm:$0xff]  ;;  %v268_v9 = vld [vmem:[#allocation4 + $0x8] sm:$0xff]  ;;  %862 = vmatprep.subr.bf16.mxu1 %v1004_v35  ;;  %v1006_v36 = vmov 0.0  }
  0x46   : > { %s745_s22 = sshll.u32 %s1183_s19, 2  ;;  %v267_v7 = vld [vmem:[#allocation4] sm:$0xff]  ;;  %295 = vperm.xlu1 %922, %v269_v8   ;;  %v256_v10 = vld [vmem:[#allocation2 + $0x28] sm:$0xff]  ;;  %v270_v11 = vld [vmem:[#allocation4 + $0x18] sm:$0xff]  ;;  %859 = vmatprep.mubr.msk.f32.mxu1 %vm1005_vm2, %v1006_v36 }
  0x47   : > { %s245_s28 = scalar_lea.vmem %s1167_s0, %s745_s22  ;;  %285 = vperm.xlu0 %921, %v267_v7   ;;  %v257_v12 = vld [vmem:[#allocation2 + $0x30] sm:$0xff]  ;;  %v271_v13 = vld [vmem:[#allocation4 + $0x20] sm:$0xff]  ;;  %v258_v14 = vld [vmem:[#allocation2 + $0x38] sm:$0xff]  ;;  %s249_s10 = scalar_lea.vmem %s1172_s5, %s745_s22 }
  0x48   : > { %v250_v1 = vld [vmem:[%s245_s28] sm:$0x7]  ;;  %v272_v15 = vld [vmem:[#allocation4 + $0x28] sm:$0xff]  ;;  %v273_v17 = vld [vmem:[#allocation4 + $0x30] sm:$0xff] }
  0x49   : > { %801 = vmatprep.subr.msk.mxu0 %vm412_vm0, %v250_v1  ;;  %v259_v16 = vld [vmem:[#allocation2 + $0x40] sm:$0xff]  ;;  %v260_v18 = vld [vmem:[#allocation2 + $0x48] sm:$0xff]  ;;  %v274_v19 = vld [vmem:[#allocation4 + $0x38] sm:$0xff] }
  0x4a   : > { %802 = vmatpush3.msk.msra.mxu0 %vm412_vm0, %v250_v1  ;;  %300 = vperm.xlu1 %922, %v270_v11   ;;  %v261_v20 = vld [vmem:[#allocation2 + $0x50] sm:$0xff]  ;;  %v275_v21 = vld [vmem:[#allocation4 + $0x40] sm:$0xff]  ;;  %v262_v22 = vld [vmem:[#allocation2 + $0x58] sm:$0xff] }
  0x4b   : > { %804 = vmatmul.mubr.msk.f32.vlgmr.msra.gmra.mrb[0].mxu0 %vm363_vm1, %v252_v3  ;;  %290 = vperm.xlu0 %921, %v268_v9   ;;  %v276_v23 = vld [vmem:[#allocation4 + $0x48] sm:$0xff]  ;;  %v263_v24 = vld [vmem:[#allocation2 + $0x60] sm:$0xff]  ;;  %v277_v25 = vld [vmem:[#allocation4 + $0x50] sm:$0xff] }
  0x4c   : > { %806 = vmatprep.mubr.msk.f32.mxu0 %vm363_vm1, %v253_v4  ;;  %v264_v26 = vld [vmem:[#allocation2 + $0x68] sm:$0xff]  ;;  %v278_v27 = vld [vmem:[#allocation4 + $0x58] sm:$0xff]  ;;  %v265_v28 = vld [vmem:[#allocation2 + $0x70] sm:$0xff] }
  0x4d   : > { %v279_v29 = vld [vmem:[#allocation4 + $0x60] sm:$0xff]  ;;  %v266_v30 = vld [vmem:[#allocation2 + $0x78] sm:$0xff]  ;;  %v280_v31 = vld [vmem:[#allocation4 + $0x68] sm:$0xff] }
  0x4e   : > { %310 = vperm.xlu1 %922, %v272_v15   ;;  %v281_v32 = vld [vmem:[#allocation4 + $0x70] sm:$0xff]  ;;  %v282_v33 = vld [vmem:[#allocation4 + $0x78] sm:$0xff]  ;;  %v578_v34 = vld [vmem:[%s1171_s4] sm:$0x7] }
  0x4f   : > { %807 = vmatmul.mubr.msk.f32.gmra.mrb[2].mxu0 %vm363_vm1, %v254_v5  ;;  %305 = vperm.xlu0 %921, %v271_v13  }
  0x50   : > { %809 = vmatprep.mubr.msk.f32.mxu0 %vm363_vm1, %v255_v6 }
  0x52   : > { %320 = vperm.xlu1 %922, %v274_v19  }
  0x53   : > { %810 = vmatmul.mubr.msk.f32.gmra.mrb[4].mxu0 %vm363_vm1, %v256_v10  ;;  %315 = vperm.xlu0 %921, %v273_v17  }
  0x54   : > { %812 = vmatprep.mubr.msk.f32.mxu0 %vm363_vm1, %v257_v12 }
  0x56   : > { %330 = vperm.xlu1 %922, %v276_v23  }
  0x57   : > { %813 = vmatmul.mubr.msk.f32.gmra.mrb[6].mxu0 %vm363_vm1, %v258_v14  ;;  %325 = vperm.xlu0 %921, %v275_v21  }
  0x58   : > { %815 = vmatprep.mubr.msk.f32.mxu0 %vm363_vm1, %v259_v16 }
  0x5a   : > { %340 = vperm.xlu1 %922, %v278_v27  }
  0x5b   : > { %816 = vmatmul.mubr.msk.f32.gmra.mrb[8].mxu0 %vm363_vm1, %v260_v18  ;;  %335 = vperm.xlu0 %921, %v277_v25  }
  0x5c   : > { %818 = vmatprep.mubr.msk.f32.mxu0 %vm363_vm1, %v261_v20 }
  0x5e   : > { %350 = vperm.xlu1 %922, %v280_v31  }
  0x5f   : > { %819 = vmatmul.mubr.msk.f32.gmra.mrb[10].mxu0 %vm363_vm1, %v262_v22  ;;  %345 = vperm.xlu0 %921, %v279_v29  }
  0x60   : > { %821 = vmatprep.mubr.msk.f32.mxu0 %vm363_vm1, %v263_v24 }
  0x62   : > { %360 = vperm.xlu1 %922, %v282_v33  }
  0x63   : > { %822 = vmatmul.mubr.msk.f32.gmra.mrb[12].mxu0 %vm363_vm1, %v264_v26  ;;  %355 = vperm.xlu0 %921, %v281_v32  }
  0x64   : > { %824 = vmatprep.mubr.msk.f32.mxu0 %vm363_vm1, %v265_v28 }
  0x67   : > { %825 = vmatmul.mubr.msk.f32.gmra.mrb[14].mxu0 %vm363_vm1, %v266_v30  ;;  %581 = vperm.xlu0 %921, %v578_v34  }
  0xc5   : > { %v296_v37 = vpop.permute.xlu1 %295 }
  0xc6   : > { %v286_v38 = vpop.permute.xlu0 %285 }
  0xc9   : > { %v301_v39 = vpop.permute.xlu1 %300 }
  0xca   : > { %v291_v40 = vpop.permute.xlu0 %290 }
  0xcd   : > { %v311_v41 = vpop.permute.xlu1 %310 }
  0xce   : > { %v306_v42 = vpop.permute.xlu0 %305 }
  0xd1   : > { %v321_v48 = vpop.permute.xlu1 %320 }
  0xd2   : > { %v316_v51 = vpop.permute.xlu0 %315 }
  0xd5   : > { %v331_v61 = vpop.permute.xlu1 %330 }
  0xd6   : > { %v326_v0 = vpop.permute.xlu0 %325 }
  0xd9   : > { %v341_v9 = vpop.permute.xlu1 %340 }
  0xda   : > { %v336_v12 = vpop.permute.xlu0 %335 }
  0xdd   : > { %v351_v22 = vpop.permute.xlu1 %350 }
  0xde   : > { %v346_v25 = vpop.permute.xlu0 %345 }
  0xe1   : > { %v361_v34 = vpop.permute.xlu1 %360 }
 0x11e   : > { %v805_v43 = vpop.f32.mrb[0].mxu0 }
 0x11f   : > { %v488_v44 = vadd.f32 %v805_v43, %v291_v40  ;;  %v482_v45 = vpop.f32.mrb[1].mxu0 }
 0x120   : > { %v483_v46 = vadd.f32 %v482_v45, %v286_v38  ;;  %v356_v38 = vpop.permute.xlu0 %355 }
 0x121   : > { %v562_v47 = vmax.f32 %v488_v44, 0.0 }
 0x122   : > { %v561_v49 = vmax.f32 %v483_v46, 0.0  ;;  %v808_v50 = vpop.f32.mrb[2].mxu0  ;;  %v577_v46 = vld [vmem:[%s1170_s3] sm:$0x7] }
 0x123   : > { %v498_v52 = vadd.f32 %v808_v50, %v301_v39  ;;  %v492_v53 = vpop.f32.mrb[3].mxu0 }
 0x124   : > { %v493_v54 = vadd.f32 %v492_v53, %v296_v37  ;;  %v863_v55 = vpack.c.bf16 %v562_v47, %v561_v49  ;;  %v582_v47 = vpop.permute.xlu0 %581 }
 0x125   : > { %v564_v56 = vmax.f32 %v498_v52, 0.0 }
 0x126   : > { %v563_v57 = vmax.f32 %v493_v54, 0.0  ;;  %v811_v58 = vpop.f32.mrb[4].mxu0  ;;  %864 = vmatpush3.bf16.msra.mxu1 %v863_v55 }
 0x127   : > { %v508_v59 = vadd.f32 %v811_v58, %v311_v41  ;;  %v502_v60 = vpop.f32.mrb[5].mxu0  ;;  %865 = vmatprep.subr.bf16.mxu1 %v1004_v35 }
 0x128   : > { %v866_v62 = vpack.c.bf16 %v564_v56, %v563_v57  ;;  %v503_v63 = vadd.f32 %v502_v60, %v306_v42 }
 0x129   : > { %v566_v1 = vmax.f32 %v508_v59, 0.0 }
 0x12a   : > { %v565_v2 = vmax.f32 %v503_v63, 0.0  ;;  %v814_v3 = vpop.f32.mrb[6].mxu0  ;;  %867 = vmatpush3.bf16.msra.mxu1 %v866_v62 }
 0x12b   : > { %v518_v4 = vadd.f32 %v814_v3, %v321_v48  ;;  %v512_v5 = vpop.f32.mrb[7].mxu0  ;;  %868 = vmatprep.subr.bf16.mxu1 %v1004_v35 }
 0x12c   : > { %v869_v6 = vpack.c.bf16 %v566_v1, %v565_v2  ;;  %v513_v7 = vadd.f32 %v512_v5, %v316_v51 }
 0x12d   : > { %v568_v8 = vmax.f32 %v518_v4, 0.0 }
 0x12e   : > { %v567_v10 = vmax.f32 %v513_v7, 0.0  ;;  %v817_v11 = vpop.f32.mrb[8].mxu0  ;;  %870 = vmatpush3.bf16.msra.mxu1 %v869_v6 }
 0x12f   : > { %v528_v13 = vadd.f32 %v817_v11, %v331_v61  ;;  %v522_v14 = vpop.f32.mrb[9].mxu0  ;;  %871 = vmatprep.subr.bf16.mxu1 %v1004_v35 }
 0x130   : > { %v872_v15 = vpack.c.bf16 %v568_v8, %v567_v10  ;;  %v523_v16 = vadd.f32 %v522_v14, %v326_v0 }
 0x131   : > { %v570_v17 = vmax.f32 %v528_v13, 0.0 }
 0x132   : > { %v569_v18 = vmax.f32 %v523_v16, 0.0  ;;  %v820_v19 = vpop.f32.mrb[10].mxu0  ;;  %873 = vmatpush3.bf16.msra.mxu1 %v872_v15 }
 0x133   : > { %v538_v20 = vadd.f32 %v820_v19, %v341_v9  ;;  %v532_v21 = vpop.f32.mrb[11].mxu0  ;;  %874 = vmatprep.subr.bf16.mxu1 %v1004_v35 }
 0x134   : > { %v875_v23 = vpack.c.bf16 %v570_v17, %v569_v18  ;;  %v533_v24 = vadd.f32 %v532_v21, %v336_v12 }
 0x135   : > { %v572_v26 = vmax.f32 %v538_v20, 0.0 }
 0x136   : > { %v571_v27 = vmax.f32 %v533_v24, 0.0  ;;  %v823_v28 = vpop.f32.mrb[12].mxu0  ;;  %876 = vmatpush3.bf16.msra.mxu1 %v875_v23 }
 0x137   : > { %v548_v29 = vadd.f32 %v823_v28, %v351_v22  ;;  %v542_v30 = vpop.f32.mrb[13].mxu0  ;;  %877 = vmatprep.subr.bf16.mxu1 %v1004_v35 }
 0x138   : > { %v878_v31 = vpack.c.bf16 %v572_v26, %v571_v27  ;;  %v543_v32 = vadd.f32 %v542_v30, %v346_v25 }
 0x139   : > { %v574_v33 = vmax.f32 %v548_v29, 0.0 }
 0x13a   : > { %v573_v36 = vmax.f32 %v543_v32, 0.0  ;;  %v826_v37 = vpop.f32.mrb[14].mxu0  ;;  %879 = vmatpush3.bf16.msra.mxu1 %v878_v31 }
 0x13b   : > { %v558_v39 = vadd.f32 %v826_v37, %v361_v34  ;;  %v552_v40 = vpop.f32.mrb[15].mxu0  ;;  %880 = vmatprep.subr.bf16.mxu1 %v1004_v35 }
 0x13c   : > { %v881_v41 = vpack.c.bf16 %v574_v33, %v573_v36  ;;  %v553_v42 = vadd.f32 %v552_v40, %v356_v38 }
 0x13d   : > { %v576_v43 = vmax.f32 %v558_v39, 0.0 }
 0x13e   : > { %v575_v44 = vmax.f32 %v553_v42, 0.0  ;;  %882 = vmatpush3.bf16.msra.mxu1 %v881_v41 }
 0x13f   : > { %883 = vmatprep.subr.bf16.mxu1 %v1004_v35 }
 0x140   : > { %v884_v45 = vpack.c.bf16 %v576_v43, %v575_v44 }
 0x142   : > { %885 = vmatpush3.bf16.msra.mxu1 %v884_v45 }
 0x145   : > { %860 = vmatmul.mubr.f32.vlgmr.msra.gmra.mrb[0].mxu1 %v577_v46 }
 0x218   : > { %v650_v48 = vpop.f32.mrb[0].mxu1 }
 0x219   : > { %v651_v49 = vadd.f32 %v650_v48, %v582_v47  ;;  %v861_v50 = vpop.f32.mrb[1].mxu1 }
 0x21b   : > { %v764_v51 = vmul.f32 -1.442695, %v651_v49 }
 0x21d   : > { %923 = vpow2.f32 %v764_v51 }
 0x227   : > { %v924_v52 = vpop.eup %923 }
 0x228   : > { %v657_v53 = vadd.f32 1.0, %v924_v52 }
 0x22a   : > { %925 = vrcp.f32 %v657_v53 }
 0x234   : > { %v926_v35 = vpop.eup %925 }
 0x235   : > { %660 = vst [vmem:[%s249_s10] sm:$0x7] %v926_v35 }
 0x236 PF: > { %s17_s18 = sadd.s32 1, %s997_s18  }
 0x237   : > { %p14_p5 = scmp.ge.s32.totalorder %s17_s18, 4  }
 0x239   :  { %16 = sbr.rel (!%p14_p5) target bundleno = 2 (0x2), region = 79 }
 0x240   :  { %680 = vsyncpa [#allocation3], 1 }
 0x241   :  { %682 = vsyncpa [#allocation3 + $0x1], 1 }
 0x242   :  { %683 = vsyncpa [#allocation5], 1 }

</bundles_post_ra>
